<compile_context>
chip_gen: v5e
topology: v5e:2x2
jax: 0.10.0
libtpu: 0.0.40
codegen_flags: <defaults>
</compile_context>

<pallas_src>
import math

import jax
import jax.numpy as jnp
from jax import lax
from jax.experimental import pallas as pl
from jax.experimental.pallas import tpu as pltpu

HIDDEN = 32                 # hidden_size
HEADS = 4                   # num_attention_heads
HEAD_DIM = HIDDEN // HEADS
INTER = 64                  # intermediate_size
NUM_LABELS = 2
L = 2                       # batch -> unbatched sequence length for the MHA
EPS = 1e-5                  # nn.LayerNorm default eps
LANES = 128                 # lane width of all packed operands
TILE = 128                  # each weight block is zero-padded to a (128,128) tile

assert HEADS * L <= 8, "stacked (head, query) rows must fit one sublane group"

# ---- weight slab: 7 stacked (128,128) tiles ----
TW_Q, TW_K, TW_V, TW_O, TW_1, TW_2, TW_FC = range(7)
W_ROWS = 7 * TILE

# ---- bias / small-vector slab rows ----
B_Q, B_K, B_V, B_O = 0, 1, 2, 3
B_LN1W, B_LN1B = 4, 5
B_1, B_2 = 6, 7
B_LN2W, B_LN2B = 8, 9
B_FC = 10
B_WD = 11        # dense (NUM_LABELS -> 1) weight stored as a lane row
B_BD = 12        # dense bias at lane 0
B_VALID = 13     # 1.0 in lanes [0, HIDDEN)
B_HMASK = 16     # rows 16:16+HEADS*L -> stacked per-(head, query) lane masks
B_ROWS = 24


def _wtile(w_ref, t):
    # full (128,128) tile: unmasked vector loads, no lane slicing
    return w_ref[t * TILE:(t + 1) * TILE, :]


def _brow(b_ref, r):
    # full 128-lane bias row
    return b_ref[r:r + 1, :]


def _layer_norm(x, valid, w, b):
    # LayerNorm over the HIDDEN valid lanes only; pad lanes of x are zero on
    # entry, and `valid` keeps them from contaminating the variance.
    mu = jnp.sum(x, axis=-1, keepdims=True) * (1.0 / HIDDEN)
    xc = (x - mu) * valid
    var = jnp.sum(xc * xc, axis=-1, keepdims=True) * (1.0 / HIDDEN)
    return xc * lax.rsqrt(var + EPS) * w + b


def bert_head_kernel(x_ref, w_ref, b_ref, o_ref):
    f32 = jnp.float32
    x = x_ref[...]                                   # (L, 128); lanes >= HIDDEN are zero
    valid = _brow(b_ref, B_VALID)                    # (1, 128)

    # ---- Q / K / V projections (1/sqrt(head_dim) folded into packed Q) ----
    q = jnp.dot(x, _wtile(w_ref, TW_Q), preferred_element_type=f32) + _brow(b_ref, B_Q)
    k = jnp.dot(x, _wtile(w_ref, TW_K), preferred_element_type=f32) + _brow(b_ref, B_K)
    v = jnp.dot(x, _wtile(w_ref, TW_V), preferred_element_type=f32) + _brow(b_ref, B_V)

    # ---- all 4 heads: ONE score matmul + ONE softmax + ONE P@V matmul ----
    hmask = b_ref[B_HMASK:B_HMASK + HEADS * L, :]            # (8, 128) prebaked masks
    q_stk = jnp.concatenate([q] * HEADS, axis=0) * hmask     # (8, 128)
    s = lax.dot_general(q_stk, k, (((1,), (1,)), ((), ())),
                        preferred_element_type=f32)           # (HEADS*L, L)
    s = s - jnp.max(s, axis=-1, keepdims=True)
    e = jnp.exp(s)
    p = e / jnp.sum(e, axis=-1, keepdims=True)                # exact softmax

    o_stk = jnp.dot(p, v, preferred_element_type=f32) * hmask  # (8, 128)
    # collapse stacked head rows back to L rows: head h output lives in its own
    # 8-lane slice, so a plain sublane-group sum reconstructs the concatenated
    # multi-head context (3 cheap adds; no cross-lane traffic, no extra MXU push).
    ctx = o_stk[0:L, :]
    for h in range(1, HEADS):
        ctx = ctx + o_stk[h * L:(h + 1) * L, :]

    attn = jnp.dot(ctx, _wtile(w_ref, TW_O), preferred_element_type=f32) + _brow(b_ref, B_O)

    # ---- residual + LayerNorm 1 ----
    h1 = _layer_norm(x + attn, valid, _brow(b_ref, B_LN1W), _brow(b_ref, B_LN1B))

    # ---- feed-forward: Linear -> ReLU -> Linear ----
    t = jnp.dot(h1, _wtile(w_ref, TW_1), preferred_element_type=f32) + _brow(b_ref, B_1)
    t = jnp.maximum(t, 0.0)
    mlp = jnp.dot(t, _wtile(w_ref, TW_2), preferred_element_type=f32) + _brow(b_ref, B_2)

    # ---- residual + LayerNorm 2 ----
    h2 = _layer_norm(h1 + mlp, valid, _brow(b_ref, B_LN2W), _brow(b_ref, B_LN2B))

    # ---- classification head: fc -> ReLU -> dense -> sigmoid ----
    f = jnp.dot(h2, _wtile(w_ref, TW_FC), preferred_element_type=f32) + _brow(b_ref, B_FC)
    f = jnp.maximum(f, 0.0)

    # dense (NUM_LABELS -> 1) on VPU/XLU: lane-masked multiply + lane reduce,
    # no MXU push for 4 MACs of useful work.
    wd = _brow(b_ref, B_WD)                                   # (1, 128), lanes 0:2 useful
    bd = jnp.sum(_brow(b_ref, B_BD), axis=-1, keepdims=True)  # scalar as (1, 1)
    z = jnp.sum(f * wd, axis=-1, keepdims=True) + bd          # (L, 1)

    # lane-dense store; the wrapper slices out the single logit column.
    o_ref[...] = jnp.broadcast_to(jax.nn.sigmoid(z), (L, LANES))


def init_params(key):
    ks = jax.random.split(key, 12)

    def w(k, shape, std=0.02):
        return std * jax.random.normal(k, shape, jnp.float32)

    return dict(
        in_proj_w=w(ks[0], (3 * HIDDEN, HIDDEN)),   # PyTorch MHA layout (3E, E)
        in_proj_b=w(ks[1], (3 * HIDDEN,), 0.01),
        out_proj_w=w(ks[2], (HIDDEN, HIDDEN)),
        out_proj_b=w(ks[3], (HIDDEN,), 0.01),
        ln1_w=jnp.ones((HIDDEN,), jnp.float32),
        ln1_b=jnp.zeros((HIDDEN,), jnp.float32),
        lin1_w=w(ks[4], (INTER, HIDDEN)),
        lin1_b=w(ks[5], (INTER,), 0.01),
        lin2_w=w(ks[6], (HIDDEN, INTER)),
        lin2_b=w(ks[7], (HIDDEN,), 0.01),
        ln2_w=jnp.ones((HIDDEN,), jnp.float32),
        ln2_b=jnp.zeros((HIDDEN,), jnp.float32),
        fc_w=w(ks[8], (NUM_LABELS, HIDDEN)),
        fc_b=w(ks[9], (NUM_LABELS,), 0.01),
        dense_w=w(ks[10], (1, NUM_LABELS)),
        dense_b=w(ks[11], (1,), 0.01),
    )


def pack_params(p):
    """Pack all parameters into two lane-128 VMEM slabs (full-tile layout)."""
    scale = 1.0 / math.sqrt(HEAD_DIM)
    # pre-transpose to [in, out]; fold the attention scale into Q weight/bias
    wq = p["in_proj_w"][0:HIDDEN].T * scale
    wk = p["in_proj_w"][HIDDEN:2 * HIDDEN].T
    wv = p["in_proj_w"][2 * HIDDEN:3 * HIDDEN].T
    wo = p["out_proj_w"].T
    w1 = p["lin1_w"].T
    w2 = p["lin2_w"].T
    wfc = p["fc_w"].T

    def tile(w):
        t = jnp.zeros((TILE, LANES), jnp.float32)
        return t.at[:w.shape[0], :w.shape[1]].set(w)

    wslab = jnp.concatenate(
        [tile(wq), tile(wk), tile(wv), tile(wo), tile(w1), tile(w2), tile(wfc)],
        axis=0)                                              # (896, 128) ~ 448 KiB

    def row(v):
        r = jnp.zeros((LANES,), jnp.float32)
        return r.at[:v.shape[0]].set(v)

    bslab = jnp.zeros((B_ROWS, LANES), jnp.float32)
    bslab = bslab.at[B_Q].set(row(p["in_proj_b"][0:HIDDEN] * scale))
    bslab = bslab.at[B_K].set(row(p["in_proj_b"][HIDDEN:2 * HIDDEN]))
    bslab = bslab.at[B_V].set(row(p["in_proj_b"][2 * HIDDEN:3 * HIDDEN]))
    bslab = bslab.at[B_O].set(row(p["out_proj_b"]))
    bslab = bslab.at[B_LN1W].set(row(p["ln1_w"]))
    bslab = bslab.at[B_LN1B].set(row(p["ln1_b"]))
    bslab = bslab.at[B_1].set(row(p["lin1_b"]))
    bslab = bslab.at[B_2].set(row(p["lin2_b"]))
    bslab = bslab.at[B_LN2W].set(row(p["ln2_w"]))
    bslab = bslab.at[B_LN2B].set(row(p["ln2_b"]))
    bslab = bslab.at[B_FC].set(row(p["fc_b"]))
    bslab = bslab.at[B_WD].set(row(p["dense_w"][0]))
    bslab = bslab.at[B_BD].set(row(p["dense_b"]))

    # pre-baked masks: valid-lane mask + stacked (head, query-row) lane masks
    lane = jnp.arange(LANES)
    bslab = bslab.at[B_VALID].set((lane < HIDDEN).astype(jnp.float32))
    for h in range(HEADS):
        m = ((lane >= h * HEAD_DIM) & (lane < (h + 1) * HEAD_DIM)).astype(jnp.float32)
        for i in range(L):
            bslab = bslab.at[B_HMASK + h * L + i].set(m)
    return wslab, bslab


def my_bert_head(pooled, wslab, bslab):
    # lane-pad the pooled activations once in the wrapper so every in-kernel
    # operand is a full 128-lane tile (no masked loads / lane slices in-kernel).
    xp = jnp.pad(pooled, ((0, 0), (0, LANES - HIDDEN)))
    vmem = pl.BlockSpec(memory_space=pltpu.MemorySpace.VMEM)
    out = pl.pallas_call(
        bert_head_kernel,
        out_shape=jax.ShapeDtypeStruct((pooled.shape[0], LANES), jnp.float32),
        in_specs=[vmem, vmem, vmem],
        out_specs=vmem,
    )(xp, wslab, bslab)
    # lane-dense store in the kernel; take the single logit column here.
    return out[:, :1]


def _reference(pooled, p):
    # pure-JAX reference with identical math (per-head sliced attention)
    x = pooled
    qkv = x @ p["in_proj_w"].T + p["in_proj_b"]
    q, k, v = qkv[:, :HIDDEN], qkv[:, HIDDEN:2 * HIDDEN], qkv[:, 2 * HIDDEN:]
    scale = 1.0 / math.sqrt(HEAD_DIM)
    outs = []
    for h in range(HEADS):
        sl = slice(h * HEAD_DIM, (h + 1) * HEAD_DIM)
        s = (q[:, sl] @ k[:, sl].T) * scale
        outs.append(jax.nn.softmax(s, axis=-1) @ v[:, sl])
    attn = jnp.concatenate(outs, axis=-1) @ p["out_proj_w"].T + p["out_proj_b"]

    def ln(y, w, b):
        mu = jnp.mean(y, -1, keepdims=True)
        var = jnp.mean((y - mu) ** 2, -1, keepdims=True)
        return (y - mu) / jnp.sqrt(var + EPS) * w + b

    h1 = ln(x + attn, p["ln1_w"], p["ln1_b"])
    t = jnp.maximum(h1 @ p["lin1_w"].T + p["lin1_b"], 0.0)
    h2 = ln(h1 + t @ p["lin2_w"].T + p["lin2_b"], p["ln2_w"], p["ln2_b"])
    f = jnp.maximum(h2 @ p["fc_w"].T + p["fc_b"], 0.0)
    return jax.nn.sigmoid(f @ p["dense_w"].T + p["dense_b"])


if __name__ == "__main__":
    key = jax.random.PRNGKey(0)
    k_pooled, k_params = jax.random.split(key)
    # synthetic stand-in for backbone(...)[1] (pooled output), shape [batch, hidden]
    pooled = jax.random.normal(k_pooled, (L, HIDDEN), jnp.float32)
    params = init_params(k_params)
    wslab, bslab = pack_params(params)

    out = my_bert_head(pooled, wslab, bslab)
    out = jax.block_until_ready(out)

    ref = _reference(pooled, params)
    assert out.shape == (L, 1)
    # exact softmax division -> tight tolerance
    assert jnp.allclose(out, ref, rtol=1e-4, atol=1e-5), (out, ref)
    print("KERNEL_OK")
</pallas_src>

<mosaic_0001>
module attributes {stable_mosaic.version = 11 : i64} {
  func.func @bert_head_kernel(%arg0: memref<2x128xf32, #tpu.memory_space<vmem>>, %arg1: memref<896x128xf32, #tpu.memory_space<vmem>>, %arg2: memref<24x128xf32, #tpu.memory_space<vmem>>, %arg3: memref<2x128xf32, #tpu.memory_space<vmem>>) attributes {dimension_semantics = [], scalar_prefetch = 0 : i64, scratch_operands = 0 : i64, tpu.core_type = #tpu.core_type<tc>} {
    %c0 = arith.constant 0 : index
    %c0_0 = arith.constant 0 : index
    %0 = vector.load %arg0[%c0, %c0_0] : memref<2x128xf32, #tpu.memory_space<vmem>>, vector<2x128xf32>
    %c13 = arith.constant 13 : index
    %c0_1 = arith.constant 0 : index
    %1 = vector.load %arg2[%c13, %c0_1] : memref<24x128xf32, #tpu.memory_space<vmem>>, vector<1x128xf32>
    %c0_2 = arith.constant 0 : index
    %c0_3 = arith.constant 0 : index
    %2 = vector.load %arg1[%c0_2, %c0_3] : memref<896x128xf32, #tpu.memory_space<vmem>>, vector<128x128xf32>
    %cst = arith.constant dense<0.000000e+00> : vector<2x128xf32>
    %3 = tpu.matmul %0, %2, %cst {dimension_numbers = #tpu.dot_dimension_numbers<[1], [0], [0], [1], [0, 0, 1, 1], [], []>} : vector<2x128xf32>, vector<128x128xf32>, vector<2x128xf32> -> vector<2x128xf32>
    %c0_4 = arith.constant 0 : index
    %c0_5 = arith.constant 0 : index
    %4 = vector.load %arg2[%c0_4, %c0_5] : memref<24x128xf32, #tpu.memory_space<vmem>>, vector<1x128xf32>
    %5 = vector.broadcast %4 : vector<1x128xf32> to vector<2x128xf32>
    %6 = arith.addf %3, %5 : vector<2x128xf32>
    %c128 = arith.constant 128 : index
    %c0_6 = arith.constant 0 : index
    %7 = vector.load %arg1[%c128, %c0_6] : memref<896x128xf32, #tpu.memory_space<vmem>>, vector<128x128xf32>
    %cst_7 = arith.constant dense<0.000000e+00> : vector<2x128xf32>
    %8 = tpu.matmul %0, %7, %cst_7 {dimension_numbers = #tpu.dot_dimension_numbers<[1], [0], [0], [1], [0, 0, 1, 1], [], []>} : vector<2x128xf32>, vector<128x128xf32>, vector<2x128xf32> -> vector<2x128xf32>
    %c1 = arith.constant 1 : index
    %c0_8 = arith.constant 0 : index
    %9 = vector.load %arg2[%c1, %c0_8] : memref<24x128xf32, #tpu.memory_space<vmem>>, vector<1x128xf32>
    %10 = vector.broadcast %9 : vector<1x128xf32> to vector<2x128xf32>
    %11 = arith.addf %8, %10 : vector<2x128xf32>
    %c256 = arith.constant 256 : index
    %c0_9 = arith.constant 0 : index
    %12 = vector.load %arg1[%c256, %c0_9] : memref<896x128xf32, #tpu.memory_space<vmem>>, vector<128x128xf32>
    %cst_10 = arith.constant dense<0.000000e+00> : vector<2x128xf32>
    %13 = tpu.matmul %0, %12, %cst_10 {dimension_numbers = #tpu.dot_dimension_numbers<[1], [0], [0], [1], [0, 0, 1, 1], [], []>} : vector<2x128xf32>, vector<128x128xf32>, vector<2x128xf32> -> vector<2x128xf32>
    %c2 = arith.constant 2 : index
    %c0_11 = arith.constant 0 : index
    %14 = vector.load %arg2[%c2, %c0_11] : memref<24x128xf32, #tpu.memory_space<vmem>>, vector<1x128xf32>
    %15 = vector.broadcast %14 : vector<1x128xf32> to vector<2x128xf32>
    %16 = arith.addf %13, %15 : vector<2x128xf32>
    %c16 = arith.constant 16 : index
    %c0_12 = arith.constant 0 : index
    %17 = vector.load %arg2[%c16, %c0_12] : memref<24x128xf32, #tpu.memory_space<vmem>>, vector<8x128xf32>
    %18 = tpu.concatenate %6, %6, %6, %6 in 0 : vector<2x128xf32>, vector<2x128xf32>, vector<2x128xf32>, vector<2x128xf32> -> vector<8x128xf32>
    %19 = arith.mulf %18, %17 : vector<8x128xf32>
    %cst_13 = arith.constant dense<0.000000e+00> : vector<8x2xf32>
    %20 = tpu.matmul %19, %11, %cst_13 {dimension_numbers = #tpu.dot_dimension_numbers<[1], [1], [0], [0], [0, 0, 1, 0], [], []>} : vector<8x128xf32>, vector<2x128xf32>, vector<8x2xf32> -> vector<8x2xf32>
    %cst_14 = arith.constant dense<0xFF800000> : vector<8xf32>
    %21 = vector.multi_reduction <maximumf>, %20, %cst_14 [1] : vector<8x2xf32> to vector<8xf32>
    %22 = vector.shape_cast %21 : vector<8xf32> to vector<8x1xf32>
    %23 = vector.broadcast %22 : vector<8x1xf32> to vector<8x2xf32>
    %24 = arith.subf %20, %23 : vector<8x2xf32>
    %25 = math.exp %24 : vector<8x2xf32>
    %cst_15 = arith.constant dense<0.000000e+00> : vector<8xf32>
    %26 = vector.multi_reduction <add>, %25, %cst_15 [1] : vector<8x2xf32> to vector<8xf32>
    %27 = vector.shape_cast %26 : vector<8xf32> to vector<8x1xf32>
    %28 = vector.broadcast %27 : vector<8x1xf32> to vector<8x2xf32>
    %29 = arith.divf %25, %28 : vector<8x2xf32>
    %cst_16 = arith.constant dense<0.000000e+00> : vector<8x128xf32>
    %30 = tpu.matmul %29, %16, %cst_16 {dimension_numbers = #tpu.dot_dimension_numbers<[1], [0], [0], [1], [0, 0, 1, 1], [], []>} : vector<8x2xf32>, vector<2x128xf32>, vector<8x128xf32> -> vector<8x128xf32>
    %31 = arith.mulf %30, %17 : vector<8x128xf32>
    %32 = vector.extract_strided_slice %31 {offsets = [0, 0], sizes = [2, 128], strides = [1, 1]} : vector<8x128xf32> to vector<2x128xf32>
    %33 = vector.extract_strided_slice %31 {offsets = [2, 0], sizes = [2, 128], strides = [1, 1]} : vector<8x128xf32> to vector<2x128xf32>
    %34 = arith.addf %32, %33 : vector<2x128xf32>
    %35 = vector.extract_strided_slice %31 {offsets = [4, 0], sizes = [2, 128], strides = [1, 1]} : vector<8x128xf32> to vector<2x128xf32>
    %36 = arith.addf %34, %35 : vector<2x128xf32>
    %37 = vector.extract_strided_slice %31 {offsets = [6, 0], sizes = [2, 128], strides = [1, 1]} : vector<8x128xf32> to vector<2x128xf32>
    %38 = arith.addf %36, %37 : vector<2x128xf32>
    %c384 = arith.constant 384 : index
    %c0_17 = arith.constant 0 : index
    %39 = vector.load %arg1[%c384, %c0_17] : memref<896x128xf32, #tpu.memory_space<vmem>>, vector<128x128xf32>
    %cst_18 = arith.constant dense<0.000000e+00> : vector<2x128xf32>
    %40 = tpu.matmul %38, %39, %cst_18 {dimension_numbers = #tpu.dot_dimension_numbers<[1], [0], [0], [1], [0, 0, 1, 1], [], []>} : vector<2x128xf32>, vector<128x128xf32>, vector<2x128xf32> -> vector<2x128xf32>
    %c3 = arith.constant 3 : index
    %c0_19 = arith.constant 0 : index
    %41 = vector.load %arg2[%c3, %c0_19] : memref<24x128xf32, #tpu.memory_space<vmem>>, vector<1x128xf32>
    %42 = vector.broadcast %41 : vector<1x128xf32> to vector<2x128xf32>
    %43 = arith.addf %40, %42 : vector<2x128xf32>
    %44 = arith.addf %0, %43 : vector<2x128xf32>
    %c4 = arith.constant 4 : index
    %c0_20 = arith.constant 0 : index
    %45 = vector.load %arg2[%c4, %c0_20] : memref<24x128xf32, #tpu.memory_space<vmem>>, vector<1x128xf32>
    %c5 = arith.constant 5 : index
    %c0_21 = arith.constant 0 : index
    %46 = vector.load %arg2[%c5, %c0_21] : memref<24x128xf32, #tpu.memory_space<vmem>>, vector<1x128xf32>
    %cst_22 = arith.constant dense<0.000000e+00> : vector<2xf32>
    %47 = vector.multi_reduction <add>, %44, %cst_22 [1] : vector<2x128xf32> to vector<2xf32>
    %48 = vector.shape_cast %47 : vector<2xf32> to vector<2x1xf32>
    %cst_23 = arith.constant 3.125000e-02 : f32
    %49 = vector.broadcast %cst_23 : f32 to vector<2x1xf32>
    %50 = arith.mulf %48, %49 : vector<2x1xf32>
    %51 = vector.broadcast %50 : vector<2x1xf32> to vector<2x128xf32>
    %52 = arith.subf %44, %51 : vector<2x128xf32>
    %53 = vector.broadcast %1 : vector<1x128xf32> to vector<2x128xf32>
    %54 = arith.mulf %52, %53 : vector<2x128xf32>
    %55 = arith.mulf %54, %54 : vector<2x128xf32>
    %cst_24 = arith.constant dense<0.000000e+00> : vector<2xf32>
    %56 = vector.multi_reduction <add>, %55, %cst_24 [1] : vector<2x128xf32> to vector<2xf32>
    %57 = vector.shape_cast %56 : vector<2xf32> to vector<2x1xf32>
    %cst_25 = arith.constant 3.125000e-02 : f32
    %58 = vector.broadcast %cst_25 : f32 to vector<2x1xf32>
    %59 = arith.mulf %57, %58 : vector<2x1xf32>
    %cst_26 = arith.constant 9.99999974E-6 : f32
    %60 = vector.broadcast %cst_26 : f32 to vector<2x1xf32>
    %61 = arith.addf %59, %60 : vector<2x1xf32>
    %62 = math.rsqrt %61 : vector<2x1xf32>
    %63 = vector.broadcast %62 : vector<2x1xf32> to vector<2x128xf32>
    %64 = arith.mulf %54, %63 : vector<2x128xf32>
    %65 = vector.broadcast %45 : vector<1x128xf32> to vector<2x128xf32>
    %66 = arith.mulf %64, %65 : vector<2x128xf32>
    %67 = vector.broadcast %46 : vector<1x128xf32> to vector<2x128xf32>
    %68 = arith.addf %66, %67 : vector<2x128xf32>
    %c512 = arith.constant 512 : index
    %c0_27 = arith.constant 0 : index
    %69 = vector.load %arg1[%c512, %c0_27] : memref<896x128xf32, #tpu.memory_space<vmem>>, vector<128x128xf32>
    %cst_28 = arith.constant dense<0.000000e+00> : vector<2x128xf32>
    %70 = tpu.matmul %68, %69, %cst_28 {dimension_numbers = #tpu.dot_dimension_numbers<[1], [0], [0], [1], [0, 0, 1, 1], [], []>} : vector<2x128xf32>, vector<128x128xf32>, vector<2x128xf32> -> vector<2x128xf32>
    %c6 = arith.constant 6 : index
    %c0_29 = arith.constant 0 : index
    %71 = vector.load %arg2[%c6, %c0_29] : memref<24x128xf32, #tpu.memory_space<vmem>>, vector<1x128xf32>
    %72 = vector.broadcast %71 : vector<1x128xf32> to vector<2x128xf32>
    %73 = arith.addf %70, %72 : vector<2x128xf32>
    %cst_30 = arith.constant 0.000000e+00 : f32
    %74 = vector.broadcast %cst_30 : f32 to vector<2x128xf32>
    %75 = arith.maximumf %73, %74 : vector<2x128xf32>
    %c640 = arith.constant 640 : index
    %c0_31 = arith.constant 0 : index
    %76 = vector.load %arg1[%c640, %c0_31] : memref<896x128xf32, #tpu.memory_space<vmem>>, vector<128x128xf32>
    %cst_32 = arith.constant dense<0.000000e+00> : vector<2x128xf32>
    %77 = tpu.matmul %75, %76, %cst_32 {dimension_numbers = #tpu.dot_dimension_numbers<[1], [0], [0], [1], [0, 0, 1, 1], [], []>} : vector<2x128xf32>, vector<128x128xf32>, vector<2x128xf32> -> vector<2x128xf32>
    %c7 = arith.constant 7 : index
    %c0_33 = arith.constant 0 : index
    %78 = vector.load %arg2[%c7, %c0_33] : memref<24x128xf32, #tpu.memory_space<vmem>>, vector<1x128xf32>
    %79 = vector.broadcast %78 : vector<1x128xf32> to vector<2x128xf32>
    %80 = arith.addf %77, %79 : vector<2x128xf32>
    %81 = arith.addf %68, %80 : vector<2x128xf32>
    %c8 = arith.constant 8 : index
    %c0_34 = arith.constant 0 : index
    %82 = vector.load %arg2[%c8, %c0_34] : memref<24x128xf32, #tpu.memory_space<vmem>>, vector<1x128xf32>
    %c9 = arith.constant 9 : index
    %c0_35 = arith.constant 0 : index
    %83 = vector.load %arg2[%c9, %c0_35] : memref<24x128xf32, #tpu.memory_space<vmem>>, vector<1x128xf32>
    %cst_36 = arith.constant dense<0.000000e+00> : vector<2xf32>
    %84 = vector.multi_reduction <add>, %81, %cst_36 [1] : vector<2x128xf32> to vector<2xf32>
    %85 = vector.shape_cast %84 : vector<2xf32> to vector<2x1xf32>
    %cst_37 = arith.constant 3.125000e-02 : f32
    %86 = vector.broadcast %cst_37 : f32 to vector<2x1xf32>
    %87 = arith.mulf %85, %86 : vector<2x1xf32>
    %88 = vector.broadcast %87 : vector<2x1xf32> to vector<2x128xf32>
    %89 = arith.subf %81, %88 : vector<2x128xf32>
    %90 = vector.broadcast %1 : vector<1x128xf32> to vector<2x128xf32>
    %91 = arith.mulf %89, %90 : vector<2x128xf32>
    %92 = arith.mulf %91, %91 : vector<2x128xf32>
    %cst_38 = arith.constant dense<0.000000e+00> : vector<2xf32>
    %93 = vector.multi_reduction <add>, %92, %cst_38 [1] : vector<2x128xf32> to vector<2xf32>
    %94 = vector.shape_cast %93 : vector<2xf32> to vector<2x1xf32>
    %cst_39 = arith.constant 3.125000e-02 : f32
    %95 = vector.broadcast %cst_39 : f32 to vector<2x1xf32>
    %96 = arith.mulf %94, %95 : vector<2x1xf32>
    %cst_40 = arith.constant 9.99999974E-6 : f32
    %97 = vector.broadcast %cst_40 : f32 to vector<2x1xf32>
    %98 = arith.addf %96, %97 : vector<2x1xf32>
    %99 = math.rsqrt %98 : vector<2x1xf32>
    %100 = vector.broadcast %99 : vector<2x1xf32> to vector<2x128xf32>
    %101 = arith.mulf %91, %100 : vector<2x128xf32>
    %102 = vector.broadcast %82 : vector<1x128xf32> to vector<2x128xf32>
    %103 = arith.mulf %101, %102 : vector<2x128xf32>
    %104 = vector.broadcast %83 : vector<1x128xf32> to vector<2x128xf32>
    %105 = arith.addf %103, %104 : vector<2x128xf32>
    %c768 = arith.constant 768 : index
    %c0_41 = arith.constant 0 : index
    %106 = vector.load %arg1[%c768, %c0_41] : memref<896x128xf32, #tpu.memory_space<vmem>>, vector<128x128xf32>
    %cst_42 = arith.constant dense<0.000000e+00> : vector<2x128xf32>
    %107 = tpu.matmul %105, %106, %cst_42 {dimension_numbers = #tpu.dot_dimension_numbers<[1], [0], [0], [1], [0, 0, 1, 1], [], []>} : vector<2x128xf32>, vector<128x128xf32>, vector<2x128xf32> -> vector<2x128xf32>
    %c10 = arith.constant 10 : index
    %c0_43 = arith.constant 0 : index
    %108 = vector.load %arg2[%c10, %c0_43] : memref<24x128xf32, #tpu.memory_space<vmem>>, vector<1x128xf32>
    %109 = vector.broadcast %108 : vector<1x128xf32> to vector<2x128xf32>
    %110 = arith.addf %107, %109 : vector<2x128xf32>
    %cst_44 = arith.constant 0.000000e+00 : f32
    %111 = vector.broadcast %cst_44 : f32 to vector<2x128xf32>
    %112 = arith.maximumf %110, %111 : vector<2x128xf32>
    %c11 = arith.constant 11 : index
    %c0_45 = arith.constant 0 : index
    %113 = vector.load %arg2[%c11, %c0_45] : memref<24x128xf32, #tpu.memory_space<vmem>>, vector<1x128xf32>
    %c12 = arith.constant 12 : index
    %c0_46 = arith.constant 0 : index
    %114 = vector.load %arg2[%c12, %c0_46] : memref<24x128xf32, #tpu.memory_space<vmem>>, vector<1x128xf32>
    %cst_47 = arith.constant dense<0.000000e+00> : vector<1xf32>
    %115 = vector.multi_reduction <add>, %114, %cst_47 [1] : vector<1x128xf32> to vector<1xf32>
    %116 = vector.shape_cast %115 : vector<1xf32> to vector<1x1xf32>
    %117 = vector.broadcast %113 : vector<1x128xf32> to vector<2x128xf32>
    %118 = arith.mulf %112, %117 : vector<2x128xf32>
    %cst_48 = arith.constant dense<0.000000e+00> : vector<2xf32>
    %119 = vector.multi_reduction <add>, %118, %cst_48 [1] : vector<2x128xf32> to vector<2xf32>
    %120 = vector.shape_cast %119 : vector<2xf32> to vector<2x1xf32>
    %121 = vector.broadcast %116 : vector<1x1xf32> to vector<2x1xf32>
    %122 = arith.addf %120, %121 : vector<2x1xf32>
    %123 = arith.negf %122 : vector<2x1xf32>
    %124 = math.exp %123 : vector<2x1xf32>
    %cst_49 = arith.constant 1.000000e+00 : f32
    %125 = vector.broadcast %cst_49 : f32 to vector<2x1xf32>
    %126 = arith.addf %125, %124 : vector<2x1xf32>
    %127 = arith.divf %125, %126 : vector<2x1xf32>
    %128 = vector.shape_cast %127 : vector<2x1xf32> to vector<2x1xf32>
    %129 = vector.broadcast %128 : vector<2x1xf32> to vector<2x128xf32>
    %c0_50 = arith.constant 0 : index
    %c0_51 = arith.constant 0 : index
    %130 = vector.load %arg3[%c0_50, %c0_51] : memref<2x128xf32, #tpu.memory_space<vmem>>, vector<2x128xf32>
    tpu.vector_store %arg3[%c0_50, %c0_51], %129 {strides = array<i32>} : memref<2x128xf32, #tpu.memory_space<vmem>>, vector<2x128xf32>,
    return
  }
}

</mosaic_0001>

<bundles_post_ra>
// kernel: tpu_custom_call.1
= control target key start
LH: loop header
LB: loop body
LE: loop exit
PB: predicated region body
PF: predicated region fallthrough
CT: control target
= control target key end

     0   :  { %8 = vsyncpa [#allocation3], 0  ;;  %s742_s0 = inlined_call_operand.hbm [shape: f32[2,128], index: 0, kind: input, shape index: {}]   ;;  %s743_s1 = inlined_call_operand.hbm [shape: f32[896,128], index: 1, kind: input, shape index: {}]   ;;  %s744_s2 = inlined_call_operand.hbm [shape: f32[24,128], index: 2, kind: input, shape index: {}]   ;;  %s745_s3 = inlined_call_operand.hbm [shape: f32[2,128], index: 3, kind: output, shape index: {}]  }
   0x1   :  { %9 = vsyncpa [#allocation6], 0  ;;  %s26_s14 = sshll.u32 %s743_s1, 4  ;;  %s27_s14 = int_to_ptr.hbm [resolvable:$true] %s26_s14 }
   0x2   :  { %10 = vsyncpa [#allocation4], 0  ;;  %s675_s15 = smov [#allocation5]   ;;  %s16_s19 = sshll.u32 %s742_s0, 4  ;;  %s17_s19 = int_to_ptr.hbm [resolvable:$true] %s16_s19 }
   0x3   :  { %s28_s16 = sshll.u32 %s675_s15, 4  ;;  %s676_s20 = smov 128   ;;  %s29_s16 = int_to_ptr.vmem [resolvable:$true] %s28_s16 }
   0x4   :  { %s677_s21 = smov 8   ;;  %s678_s22 = smov [#allocation2]  }
   0x5   :  { %34 = dma.hbm_to_vmem [thread:$0]  %s27_s14, 14336, %s29_s16, [#allocation6], %s676_s20, %s676_s20, %s677_s21  }
   0x6   :  { %s18_s23 = sshll.u32 %s678_s22, 4  ;;  %s39_s26 = sshll.u32 %s744_s2, 4  ;;  %s19_s23 = int_to_ptr.vmem [resolvable:$true] %s18_s23  ;;  %s40_s26 = int_to_ptr.hbm [resolvable:$true] %s39_s26 }
   0x7   :  { %21 = dma.hbm_to_vmem [thread:$0]  %s17_s19, 32, %s19_s23, [#allocation3]  }
   0x8   :  { %s679_s1 = smov [#allocation7]  }
   0x9   :  { %s41_s27 = sshll.u32 %s679_s1, 4  ;;  %s42_s27 = int_to_ptr.vmem [resolvable:$true] %s41_s27 }
   0xa   :  { %47 = dma.hbm_to_vmem [thread:$0]  %s40_s26, 384, %s42_s27, [#allocation6], %s676_s20, %s676_s20, %s677_s21  }
   0xb   :  { %669 = dma.done.wait [#allocation3], 32  }
   0xc   :  { %670 = vsyncadd [#allocation3], 4294967264 }
   0xd   :  { %671 = dma.done.wait [#allocation6], 14720  }
   0xe   :  { %672 = vsyncadd [#allocation6], 4294952576  ;;  %v77_v0 = vld [vmem:[#allocation5 + $0x78] sm:$0xff]  ;;  %v76_v1 = vld [vmem:[#allocation5 + $0x70] sm:$0xff]  ;;  %vm184_vm0 = vcmask 1041408   ;;  %vm186_vm1 = vcmask 1043456  }
   0xf   :  { %80 = vmatpush.msra.mxu0 %v77_v0  ;;  %v115_v2 = vld [vmem:[#allocation5 + $0xf8] sm:$0xff]  ;;  %v114_v3 = vld [vmem:[#allocation5 + $0xf0] sm:$0xff]  ;;  %v75_v4 = vld [vmem:[#allocation5 + $0x68] sm:$0xff]  ;;  %vm188_vm2 = vcmask 1045504   ;;  %vm211_vm3 = vcmask 15360   ;;  %vm490_vm14 = vcmask 1040384  }
  0x10   :  { %118 = vmatpush.msra.mxu1 %v115_v2  ;;  %v113_v5 = vld [vmem:[#allocation5 + $0xe8] sm:$0xff]  ;;  %v74_v6 = vld [vmem:[#allocation5 + $0x60] sm:$0xff]  ;;  %v73_v8 = vld [vmem:[#allocation5 + $0x58] sm:$0xff]  ;;  %s680_s0 = smov [#allocation8]   ;;  %s528_s30 = sshll.u32 %s745_s3, 4  ;;  %s529_s30 = int_to_ptr.hbm [resolvable:$true] %s528_s30 }
  0x11   :  { %81 = vmatpush.msra.mxu0 %v76_v1  ;;  %v112_v7 = vld [vmem:[#allocation5 + $0xe0] sm:$0xff]  ;;  %v111_v9 = vld [vmem:[#allocation5 + $0xd8] sm:$0xff]  ;;  %v72_v10 = vld [vmem:[#allocation5 + $0x50] sm:$0xff]  ;;  %s526_s2 = sshll.u32 %s680_s0, 4  ;;  %s527_s2 = int_to_ptr.vmem [resolvable:$true] %s526_s2 }
  0x12   :  { %119 = vmatpush.msra.mxu1 %v114_v3  ;;  %v110_v11 = vld [vmem:[#allocation5 + $0xd0] sm:$0xff]  ;;  %v71_v12 = vld [vmem:[#allocation5 + $0x48] sm:$0xff]  ;;  %v70_v13 = vld [vmem:[#allocation5 + $0x40] sm:$0xff] }
  0x13   :  { %82 = vmatpush.msra.mxu0 %v75_v4  ;;  %v109_v14 = vld [vmem:[#allocation5 + $0xc8] sm:$0xff]  ;;  %v108_v15 = vld [vmem:[#allocation5 + $0xc0] sm:$0xff]  ;;  %v69_v16 = vld [vmem:[#allocation5 + $0x38] sm:$0xff] }
  0x14   :  { %120 = vmatpush.msra.mxu1 %v113_v5  ;;  %v107_v17 = vld [vmem:[#allocation5 + $0xb8] sm:$0xff]  ;;  %v68_v18 = vld [vmem:[#allocation5 + $0x30] sm:$0xff]  ;;  %v67_v20 = vld [vmem:[#allocation5 + $0x28] sm:$0xff] }
  0x15   :  { %83 = vmatpush.msra.mxu0 %v74_v6  ;;  %v106_v19 = vld [vmem:[#allocation5 + $0xb0] sm:$0xff]  ;;  %v105_v21 = vld [vmem:[#allocation5 + $0xa8] sm:$0xff]  ;;  %v66_v22 = vld [vmem:[#allocation5 + $0x20] sm:$0xff] }
  0x16   :  { %121 = vmatpush.msra.mxu1 %v112_v7  ;;  %v104_v23 = vld [vmem:[#allocation5 + $0xa0] sm:$0xff]  ;;  %v65_v24 = vld [vmem:[#allocation5 + $0x18] sm:$0xff]  ;;  %v64_v26 = vld [vmem:[#allocation5 + $0x10] sm:$0xff] }
  0x17   :  { %84 = vmatpush.msra.mxu0 %v73_v8  ;;  %v103_v25 = vld [vmem:[#allocation5 + $0x98] sm:$0xff]  ;;  %v102_v27 = vld [vmem:[#allocation5 + $0x90] sm:$0xff]  ;;  %v63_v28 = vld [vmem:[#allocation5 + $0x8] sm:$0xff] }
  0x18   :  { %122 = vmatpush.msra.mxu1 %v111_v9  ;;  %v101_v29 = vld [vmem:[#allocation5 + $0x88] sm:$0xff]  ;;  %v62_v30 = vld [vmem:[#allocation5] sm:$0xff]  ;;  %v710_v31 = vld [vmem:[#allocation2] sm:$0x3] }
  0x19   :  { %85 = vmatpush.msra.mxu0 %v72_v10  ;;  %v100_v32 = vld [vmem:[#allocation5 + $0x80] sm:$0xff]  ;;  %v714_v41 = vld [vmem:[#allocation7 + $0x10] sm:$0xff]  ;;  %v153_v47 = vld [vmem:[#allocation5 + $0x178] sm:$0xff] }
  0x1a   :  { %123 = vmatpush.msra.mxu1 %v110_v11  ;;  %v548_v33 = vld [vmem:[#allocation7] ss:$0 sm:$0xff]  ;;  %v549_v34 = vld [vmem:[#allocation7 + $0x1] ss:$0 sm:$0xff]  ;;  %v152_v48 = vld [vmem:[#allocation5 + $0x170] sm:$0xff]  ;;  %156 = vmatpush.msra.mxu2 %v153_v47 }
  0x1b   :  { %86 = vmatpush.msra.mxu0 %v71_v12  ;;  %v151_v49 = vld [vmem:[#allocation5 + $0x168] sm:$0xff]  ;;  %v150_v50 = vld [vmem:[#allocation5 + $0x160] sm:$0xff]  ;;  %v149_v51 = vld [vmem:[#allocation5 + $0x158] sm:$0xff] }
  0x1c   :  { %124 = vmatpush.msra.mxu1 %v109_v14  ;;  %157 = vmatpush.msra.mxu2 %v152_v48  ;;  %v148_v52 = vld [vmem:[#allocation5 + $0x150] sm:$0xff]  ;;  %v147_v53 = vld [vmem:[#allocation5 + $0x148] sm:$0xff]  ;;  %v146_v54 = vld [vmem:[#allocation5 + $0x140] sm:$0xff] }
  0x1d   :  { %87 = vmatpush.msra.mxu0 %v70_v13  ;;  %v145_v55 = vld [vmem:[#allocation5 + $0x138] sm:$0xff]  ;;  %v144_v56 = vld [vmem:[#allocation5 + $0x130] sm:$0xff]  ;;  %v143_v57 = vld [vmem:[#allocation5 + $0x128] sm:$0xff] }
  0x1e   :  { %125 = vmatpush.msra.mxu1 %v108_v15  ;;  %158 = vmatpush.msra.mxu2 %v151_v49  ;;  %v142_v58 = vld [vmem:[#allocation5 + $0x120] sm:$0xff]  ;;  %v141_v59 = vld [vmem:[#allocation5 + $0x118] sm:$0xff]  ;;  %v140_v62 = vld [vmem:[#allocation5 + $0x110] sm:$0xff] }
  0x1f   :  { %88 = vmatpush.msra.mxu0 %v69_v16  ;;  %v139_v63 = vld [vmem:[#allocation5 + $0x108] sm:$0xff]  ;;  %v138_v0 = vld [vmem:[#allocation5 + $0x100] sm:$0xff]  ;;  %v288_v9 = vld [vmem:[#allocation5 + $0x1f8] sm:$0xff] }
  0x20   :  { %126 = vmatpush.msra.mxu1 %v107_v17  ;;  %159 = vmatpush.msra.mxu2 %v150_v50  ;;  %v550_v6 = vld [vmem:[#allocation7 + $0x2] ss:$0 sm:$0xff]  ;;  %v287_v10 = vld [vmem:[#allocation5 + $0x1f0] sm:$0xff]  ;;  %v286_v11 = vld [vmem:[#allocation5 + $0x1e8] sm:$0xff] }
  0x21   :  { %89 = vmatpush.msra.mxu0 %v68_v18  ;;  %v285_v12 = vld [vmem:[#allocation5 + $0x1e0] sm:$0xff]  ;;  %v284_v13 = vld [vmem:[#allocation5 + $0x1d8] sm:$0xff]  ;;  %v283_v14 = vld [vmem:[#allocation5 + $0x1d0] sm:$0xff] }
  0x22   :  { %127 = vmatpush.msra.mxu1 %v106_v19  ;;  %160 = vmatpush.msra.mxu2 %v149_v51  ;;  %v282_v15 = vld [vmem:[#allocation5 + $0x1c8] sm:$0xff]  ;;  %v281_v17 = vld [vmem:[#allocation5 + $0x1c0] sm:$0xff]  ;;  %v280_v18 = vld [vmem:[#allocation5 + $0x1b8] sm:$0xff] }
  0x23   :  { %90 = vmatpush.msra.mxu0 %v67_v20  ;;  %v279_v19 = vld [vmem:[#allocation5 + $0x1b0] sm:$0xff]  ;;  %v551_v47 = vld [vmem:[#allocation7 + $0x3] ss:$0 sm:$0xff] }
  0x24   :  { %128 = vmatpush.msra.mxu1 %v105_v21  ;;  %161 = vmatpush.msra.mxu2 %v148_v52  ;;  %v357_v52 = vld [vmem:[#allocation5 + $0x278] sm:$0xff] }
  0x25   :  { %91 = vmatpush.msra.mxu0 %v66_v22 }
  0x26   :  { %129 = vmatpush.msra.mxu1 %v104_v23  ;;  %162 = vmatpush.msra.mxu2 %v147_v53  ;;  %v356_v53 = vld [vmem:[#allocation5 + $0x270] sm:$0xff] }
  0x27   :  { %92 = vmatpush.msra.mxu0 %v65_v24 }
  0x28   :  { %130 = vmatpush.msra.mxu1 %v103_v25  ;;  %163 = vmatpush.msra.mxu2 %v146_v54 }
  0x29   :  { %93 = vmatpush.msra.mxu0 %v64_v26 }
  0x2a   :  { %131 = vmatpush.msra.mxu1 %v102_v27  ;;  %164 = vmatpush.msra.mxu2 %v145_v55  ;;  %v726_v55 = vld [vmem:[#allocation7 + $0xd] ss:$0 sm:$0xff] }
  0x2b   :  { %94 = vmatpush.msra.mxu0 %v63_v28 }
  0x2c   :  { %132 = vmatpush.msra.mxu1 %v101_v29  ;;  %165 = vmatpush.msra.mxu2 %v144_v56 }
  0x2d   :  { %95 = vmatpush.msra.mxu0 %v62_v30 }
  0x2e   :  { %96 = vmatmul.f32.vlgmr.msra.gmra.mxu0 %v710_v31  ;;  %133 = vmatpush.msra.mxu1 %v100_v32  ;;  %v278_v32 = vld [vmem:[#allocation5 + $0x1a8] sm:$0xff] }
  0x2f   :  { %134 = vmatmul.f32.vlgmr.msra.gmra.mxu1 %v710_v31  ;;  %166 = vmatpush.msra.mxu2 %v143_v57 }
  0x30   :  { %360 = vmatpush.msrb.mxu0 %v357_v52  ;;  %v463_v52 = vld [vmem:[#allocation5 + $0x370] sm:$0xff] }
  0x31   :  { %167 = vmatpush.msra.mxu2 %v142_v58 }
  0x32   :  { %361 = vmatpush.msrb.mxu0 %v356_v53 }
  0x33   :  { %168 = vmatpush.msra.mxu2 %v141_v59  ;;  %v355_v59 = vld [vmem:[#allocation5 + $0x268] sm:$0xff] }
  0x34   :  { %362 = vmatpush.msrb.mxu0 %v355_v59  ;;  %v461_v59 = vld [vmem:[#allocation5 + $0x360] sm:$0xff] }
  0x35   :  { %169 = vmatpush.msra.mxu2 %v140_v62  ;;  %v352_v62 = vld [vmem:[#allocation5 + $0x250] sm:$0xff] }
  0x37   :  { %170 = vmatpush.msra.mxu2 %v139_v63  ;;  %v351_v63 = vld [vmem:[#allocation5 + $0x248] sm:$0xff] }
  0x39   :  { %171 = vmatpush.msra.mxu2 %v138_v0  ;;  %v350_v0 = vld [vmem:[#allocation5 + $0x240] sm:$0xff] }
  0x3a   :  { %172 = vmatmul.f32.vlgmr.msra.gmra.mxu2 %v710_v31 }
  0xab   :  { %v97_v35 = vpop.f32.mrf.mxu0 }
  0xac   :  { %v98_v36 = vadd.f32 %v548_v33, %v97_v35  ;;  %v135_v37 = vpop.f32.mrf.mxu1  ;;  %v277_v33 = vld [vmem:[#allocation5 + $0x1a0] sm:$0xff]  ;;  %v275_v35 = vld [vmem:[#allocation5 + $0x190] sm:$0xff] }
  0xad   :  { %v136_v38 = vadd.f32 %v549_v34, %v135_v37  ;;  %v276_v34 = vld [vmem:[#allocation5 + $0x198] sm:$0xff]  ;;  %v273_v37 = vld [vmem:[#allocation5 + $0x180] sm:$0xff] }
  0xae   :  { %v178_v39 = vrot.slane %v98_v36, 6  ;;  %v180_v40 = vrot.slane %v98_v36, 4  ;;  %v182_v42 = vrot.slane %v98_v36, 2 }
  0xaf   :  { %206 = vmatpush.xpose.msra.mxu3 %v136_v38 }
  0xb0   :  { %v185_v43 = vsel %vm184_vm0, %v98_v36, %v178_v39  ;;  %v274_v36 = vld [vmem:[#allocation5 + $0x188] sm:$0xff] }
  0xb1   :  { %v187_v44 = vsel %vm186_vm1, %v185_v43, %v180_v40 }
  0xb2   :  { %v189_v45 = vsel %vm188_vm2, %v187_v44, %v182_v42 }
  0xb3   :  { %v190_v46 = vmul.f32 %v189_v45, %v714_v41 }
  0xb5   :  { %207 = vmatmul.f32.vlgmr.msra.gmra.mxu3 %v190_v46 }
  0xbd   :  { %v173_v7 = vpop.f32.mrf.mxu2 }
  0xbe   :  { %v174_v8 = vadd.f32 %v550_v6, %v173_v7  ;;  %v344_v6 = vld [vmem:[#allocation5 + $0x210] sm:$0xff]  ;;  %v343_v7 = vld [vmem:[#allocation5 + $0x208] sm:$0xff] }
  0xc0   :  { %539 = vmatpush.msk.msrb.mxu3 %vm184_vm0, %v174_v8  ;;  %v342_v8 = vld [vmem:[#allocation5 + $0x200] sm:$0xff] }
  0xc2   :  { %291 = vmatpush.msra.mxu3 %v288_v9  ;;  %v396_v9 = vld [vmem:[#allocation5 + $0x2f8] sm:$0xff] }
  0xc3   :  { %399 = vmatpush.msrb.mxu1 %v396_v9 }
  0xc4   :  { %292 = vmatpush.msra.mxu3 %v287_v10  ;;  %v395_v10 = vld [vmem:[#allocation5 + $0x2f0] sm:$0xff] }
  0xc5   :  { %400 = vmatpush.msrb.mxu1 %v395_v10 }
  0xc6   :  { %293 = vmatpush.msra.mxu3 %v286_v11  ;;  %v394_v11 = vld [vmem:[#allocation5 + $0x2e8] sm:$0xff] }
  0xc7   :  { %401 = vmatpush.msrb.mxu1 %v394_v11 }
  0xc8   :  { %294 = vmatpush.msra.mxu3 %v285_v12 }
  0xca   :  { %295 = vmatpush.msra.mxu3 %v284_v13 }
  0xcc   :  { %296 = vmatpush.msra.mxu3 %v283_v14  ;;  %v393_v14 = vld [vmem:[#allocation5 + $0x2e0] sm:$0xff] }
  0xcd   :  { %402 = vmatpush.msrb.mxu1 %v393_v14 }
  0xce   :  { %297 = vmatpush.msra.mxu3 %v282_v15 }
  0xd0   :  { %298 = vmatpush.msra.mxu3 %v281_v17  ;;  %v391_v17 = vld [vmem:[#allocation5 + $0x2d0] sm:$0xff] }
  0xd2   :  { %299 = vmatpush.msra.mxu3 %v280_v18  ;;  %v390_v18 = vld [vmem:[#allocation5 + $0x2c8] sm:$0xff] }
  0xd4   :  { %300 = vmatpush.msra.mxu3 %v279_v19  ;;  %v389_v19 = vld [vmem:[#allocation5 + $0x2c0] sm:$0xff] }
  0xd6   :  { %301 = vmatpush.msra.mxu3 %v278_v32  ;;  %v553_v32 = vld [vmem:[#allocation7 + $0x4] ss:$0 sm:$0xff] }
  0xd8   :  { %302 = vmatpush.msra.mxu3 %v277_v33 }
  0xda   :  { %303 = vmatpush.msra.mxu3 %v276_v34 }
  0xdc   :  { %304 = vmatpush.msra.mxu3 %v275_v35  ;;  %v554_v35 = vld [vmem:[#allocation7 + $0x5] ss:$0 sm:$0xff] }
  0xde   :  { %305 = vmatpush.msra.mxu3 %v274_v36 }
  0xe0   :  { %306 = vmatpush.msra.mxu3 %v273_v37 }
 0x138   :  { %v208_v60 = vpop.f32.mrf.mxu3 }
 0x139   :  { %v212_v61 = vsel %vm211_vm3, %v208_v60, -inf }
 0x13a   :  { %213 = vmax.xlane.f32.xlu0 %v212_v61  ;;  %v353_v61 = vld [vmem:[#allocation5 + $0x258] sm:$0xff] }
 0x1ad   :  { %v214_v1 = vpop.xlane.xlu0 %213 }
 0x1ae   :  { %v215_v2 = vsub.f32 %v208_v60, %v214_v1  ;;  %v354_v60 = vld [vmem:[#allocation5 + $0x260] sm:$0xff]  ;;  %v349_v1 = vld [vmem:[#allocation5 + $0x238] sm:$0xff] }
 0x1af   :  { %363 = vmatpush.msrb.mxu0 %v354_v60  ;;  %v460_v60 = vld [vmem:[#allocation5 + $0x358] sm:$0xff] }
 0x1b0   :  { %v216_v3 = vmul.f32 1.442695, %v215_v2  ;;  %v348_v2 = vld [vmem:[#allocation5 + $0x230] sm:$0xff] }
 0x1b1   :  { %364 = vmatpush.msrb.mxu0 %v353_v61  ;;  %v459_v61 = vld [vmem:[#allocation5 + $0x350] sm:$0xff] }
 0x1b2   :  { %561 = vpow2.f32 %v216_v3  ;;  %v347_v3 = vld [vmem:[#allocation5 + $0x228] sm:$0xff] }
 0x1b3   :  { %365 = vmatpush.msrb.mxu0 %v352_v62  ;;  %v458_v62 = vld [vmem:[#allocation5 + $0x348] sm:$0xff] }
 0x1b5   :  { %366 = vmatpush.msrb.mxu0 %v351_v63  ;;  %v457_v63 = vld [vmem:[#allocation5 + $0x340] sm:$0xff] }
 0x1b7   :  { %367 = vmatpush.msrb.mxu0 %v350_v0  ;;  %v456_v0 = vld [vmem:[#allocation5 + $0x338] sm:$0xff] }
 0x1b8   :  { %v562_v4 = vpop.eup %561 }
 0x1b9   :  { %v218_v5 = vsel %vm211_vm3, %v562_v4, 0.0  ;;  %368 = vmatpush.msrb.mxu0 %v349_v1  ;;  %v455_v1 = vld [vmem:[#allocation5 + $0x330] sm:$0xff] }
 0x1ba   :  { %219 = vadd.xlane.f32.xlu0 %v218_v5  ;;  %v345_v5 = vld [vmem:[#allocation5 + $0x218] sm:$0xff] }
 0x1bb   :  { %369 = vmatpush.msrb.mxu0 %v348_v2  ;;  %v453_v2 = vld [vmem:[#allocation5 + $0x320] sm:$0xff] }
 0x1bd   :  { %370 = vmatpush.msrb.mxu0 %v347_v3  ;;  %v452_v3 = vld [vmem:[#allocation5 + $0x318] sm:$0xff] }
 0x22d   :  { %v220_v16 = vpop.xlane.xlu0 %219 }
 0x22e   :  { %563 = vrcp.f32 %v220_v16  ;;  %v232_v23 = vand.u32 2147483648, %v220_v16  ;;  %v230_v25 = vand.u32 2147483647, %v220_v16  ;;  %vm226_vm5 = vweird.f32 %v220_v16 }
 0x230   :  { %v233_v27 = vor.u32 1.1754944e-38, %v232_v23  ;;  %vm231_vm7 = vcmp.eq.f32.partialorder %v230_v25, 8.507059e+37  ;;  %v387_v23 = vld [vmem:[#allocation5 + $0x2b0] sm:$0xff]  ;;  %v386_v25 = vld [vmem:[#allocation5 + $0x2a8] sm:$0xff] }
 0x234   :  { %v564_v20 = vpop.eup %563 }
 0x235   :  { %v222_v21 = vmul.f32 %v564_v20, %v220_v16  ;;  %vm227_vm4 = vweird.f32 %v564_v20  ;;  %v392_v16 = vld [vmem:[#allocation5 + $0x2d8] sm:$0xff] }
 0x236   :  { %vm228_vm6 = vmor %vm226_vm5, %vm227_vm4  ;;  %403 = vmatpush.msrb.mxu1 %v392_v16  ;;  %v557_v16 = vld [vmem:[#allocation7 + $0x8] ss:$0 sm:$0xff] }
 0x237   :  { %v223_v22 = vsub.f32 1.0, %v222_v21  ;;  %v388_v21 = vld [vmem:[#allocation5 + $0x2b8] sm:$0xff] }
 0x238   :  { %404 = vmatpush.msrb.mxu1 %v391_v17 }
 0x239   :  { %v224_v24 = vmul.f32 %v564_v20, %v223_v22 }
 0x23a   :  { %405 = vmatpush.msrb.mxu1 %v390_v18 }
 0x23b   :  { %v225_v26 = vadd.f32 %v564_v20, %v224_v24 }
 0x23c   :  { %406 = vmatpush.msrb.mxu1 %v389_v19  ;;  %v558_v19 = vld [vmem:[#allocation7 + $0x9] ss:$0 sm:$0xff] }
 0x23d   :  { %v229_v28 = vsel %vm228_vm6, %v564_v20, %v225_v26 }
 0x23e   :  { %v234_v29 = vsel %vm231_vm7, %v233_v27, %v229_v28  ;;  %407 = vmatpush.msrb.mxu1 %v388_v21  ;;  %v385_v27 = vld [vmem:[#allocation5 + $0x2a0] sm:$0xff] }
 0x23f   :  { %v235_v30 = vmul.f32 %v562_v4, %v234_v29  ;;  %v346_v4 = vld [vmem:[#allocation5 + $0x220] sm:$0xff]  ;;  %v384_v29 = vld [vmem:[#allocation5 + $0x298] sm:$0xff] }
 0x240   :  { %371 = vmatpush.msrb.mxu0 %v346_v4  ;;  %408 = vmatpush.msrb.mxu1 %v387_v23  ;;  %v451_v4 = vld [vmem:[#allocation5 + $0x310] sm:$0xff] }
 0x241   :  { %540 = vmatmul.msk.f32.vlgmr.msrb.gmra.mxu3 %vm211_vm3, %v235_v30 }
 0x242   :  { %372 = vmatpush.msrb.mxu0 %v345_v5  ;;  %409 = vmatpush.msrb.mxu1 %v386_v25  ;;  %v450_v5 = vld [vmem:[#allocation5 + $0x308] sm:$0xff] }
 0x244   :  { %373 = vmatpush.msrb.mxu0 %v344_v6  ;;  %410 = vmatpush.msrb.mxu1 %v385_v27  ;;  %v449_v6 = vld [vmem:[#allocation5 + $0x300] sm:$0xff]  ;;  %v560_v27 = vld [vmem:[#allocation7 + $0xb] ss:$0 sm:$0xff] }
 0x246   :  { %374 = vmatpush.msrb.mxu0 %v343_v7  ;;  %411 = vmatpush.msrb.mxu1 %v384_v29 }
 0x248   :  { %375 = vmatpush.msrb.mxu0 %v342_v8 }
 0x2c4   :  { %v259_v38 = vpop.f32.mrf.mxu3 }
 0x2c5   :  { %v262_v39 = vmul.f32 %v259_v38, %v714_v41  ;;  %v383_v38 = vld [vmem:[#allocation5 + $0x290] sm:$0xff] }
 0x2c6   :  { %412 = vmatpush.msrb.mxu1 %v383_v38 }
 0x2c7   :  { %v264_v40 = vrot.slane %v262_v39, 2  ;;  %v267_v43 = vrot.slane %v262_v39, 4  ;;  %v270_v44 = vrot.slane %v262_v39, 6 }
 0x2c9   :  { %v266_v42 = vadd.f32 %v264_v40, %v262_v39  ;;  %v382_v39 = vld [vmem:[#allocation5 + $0x288] sm:$0xff]  ;;  %v381_v40 = vld [vmem:[#allocation5 + $0x280] sm:$0xff] }
 0x2ca   :  { %413 = vmatpush.msrb.mxu1 %v382_v39 }
 0x2cb   :  { %v269_v45 = vadd.f32 %v267_v43, %v266_v42  ;;  %v555_v42 = vld [vmem:[#allocation7 + $0x6] ss:$0 sm:$0xff] }
 0x2cc   :  { %414 = vmatpush.msrb.mxu1 %v381_v40 }
 0x2cd   :  { %v272_v46 = vadd.f32 %v270_v44, %v269_v45 }
 0x2cf   :  { %307 = vmatmul.f32.vlgmr.msra.gmra.mxu3 %v272_v46  ;;  %v556_v46 = vld [vmem:[#allocation7 + $0x7] ss:$0 sm:$0xff] }
 0x352   :  { %v308_v48 = vpop.f32.mrf.mxu3 }
 0x353   :  { %v309_v49 = vadd.f32 %v551_v47, %v308_v48 }
 0x355   :  { %v311_v50 = vadd.f32 %v309_v49, %v710_v31 }
 0x357   :  { %v314_v51 = vsel %vm184_vm0, %v311_v50, 0.0 }
 0x358   :  { %315 = vadd.xlane.f32.xlu1 %v314_v51  ;;  %v464_v51 = vld [vmem:[#allocation5 + $0x378] sm:$0xff] }
 0x359   :  { %467 = vmatpush.msrb.mxu2 %v464_v51 }
 0x35b   :  { %468 = vmatpush.msrb.mxu2 %v463_v52 }
 0x3cb   :  { %v316_v41 = vpop.xlane.xlu1 %315 }
 0x3cc   :  { %v317_v54 = vmul.f32 0.03125, %v316_v41 }
 0x3ce   :  { %v318_v56 = vsub.f32 %v311_v50, %v317_v54 }
 0x3d0   :  { %v729_v57 = vmul.f32 %v726_v55, %v318_v56 }
 0x3d2   :  { %v321_v58 = vmul.f32 %v729_v57, %v729_v57 }
 0x3d4   :  { %v322_v31 = vsel %vm184_vm0, %v321_v58, 0.0 }
 0x3d5   :  { %323 = vadd.xlane.f32.xlu1 %v322_v31  ;;  %v462_v31 = vld [vmem:[#allocation5 + $0x368] sm:$0xff] }
 0x3d6   :  { %469 = vmatpush.msrb.mxu2 %v462_v31 }
 0x3d8   :  { %470 = vmatpush.msrb.mxu2 %v461_v59 }
 0x3da   :  { %471 = vmatpush.msrb.mxu2 %v460_v60 }
 0x3dc   :  { %472 = vmatpush.msrb.mxu2 %v459_v61 }
 0x3de   :  { %473 = vmatpush.msrb.mxu2 %v458_v62 }
 0x3e0   :  { %474 = vmatpush.msrb.mxu2 %v457_v63 }
 0x3e2   :  { %475 = vmatpush.msrb.mxu2 %v456_v0 }
 0x3e4   :  { %476 = vmatpush.msrb.mxu2 %v455_v1 }
 0x448   :  { %v324_v12 = vpop.xlane.xlu1 %323 }
 0x449   :  { %v325_v13 = vmul.f32 0.03125, %v324_v12 }
 0x44b   :  { %v326_v15 = vadd.f32 1e-05, %v325_v13 }
 0x44d   :  { %565 = vrsqrt.f32 %v326_v15  ;;  %vm333_vm9 = vweird.f32 %v326_v15 }
 0x453   :  { %v566_v20 = vpop.eup %565 }
 0x454   :  { %v328_v22 = vmul.f32 %v566_v20, %v326_v15  ;;  %vm334_vm8 = vweird.f32 %v566_v20 }
 0x455   :  { %vm335_vm10 = vmor %vm333_vm9, %vm334_vm8 }
 0x456   :  { %v329_v24 = vmul.f32 %v566_v20, %v328_v22  ;;  %v489_v22 = vld [vmem:[#allocation7 + $0xc] sm:$0x1] }
 0x457   :  { %v491_v23 = vsel %vm490_vm14, %v489_v22, 0.0 }
 0x458   :  { %v330_v26 = vmul.f32 0.5, %v329_v24  ;;  %492 = vadd.xlane.f32.xlu0 %v491_v23  ;;  %v559_v24 = vld [vmem:[#allocation7 + $0xa] ss:$0 sm:$0xff] }
 0x45a   :  { %v331_v28 = vsub.f32 1.5, %v330_v26 }
 0x45c   :  { %v332_v30 = vmul.f32 %v566_v20, %v331_v28 }
 0x45e   :  { %v336_v33 = vsel %vm335_vm10, %v566_v20, %v332_v30 }
 0x45f   :  { %v337_v34 = vmul.f32 %v336_v33, %v729_v57 }
 0x461   :  { %v339_v36 = vmul.f32 %v553_v32, %v337_v34 }
 0x463   :  { %v341_v37 = vadd.f32 %v554_v35, %v339_v36 }
 0x465   :  { %376 = vmatmul.f32.vlgmr.msrb.gmra.mxu0 %v341_v37 }
 0x4cb   :  { %v493_v32 = vpop.xlane.xlu0 %492 }
 0x4cc   :  { %v499_v33 = vperm.slane %v493_v32, 0 }
 0x4e2   :  { %v377_v43 = vpop.f32.mrf.mxu0 }
 0x4e3   :  { %v378_v44 = vadd.f32 %v555_v42, %v377_v43 }
 0x4e5   :  { %v380_v45 = vmax.f32 %v378_v44, 0.0 }
 0x4e7   :  { %415 = vmatmul.f32.vlgmr.msrb.gmra.mxu1 %v380_v45 }
 0x564   :  { %v416_v47 = vpop.f32.mrf.mxu1 }
 0x565   :  { %v417_v48 = vadd.f32 %v556_v46, %v416_v47 }
 0x567   :  { %v419_v49 = vadd.f32 %v417_v48, %v341_v37 }
 0x569   :  { %v422_v50 = vsel %vm184_vm0, %v419_v49, 0.0 }
 0x56a   :  { %423 = vadd.xlane.f32.xlu2 %v422_v50 }
 0x5dd   :  { %v424_v53 = vpop.xlane.xlu2 %423 }
 0x5de   :  { %v425_v41 = vmul.f32 0.03125, %v424_v53 }
 0x5e0   :  { %v426_v54 = vsub.f32 %v419_v49, %v425_v41 }
 0x5e2   :  { %v427_v56 = vmul.f32 %v726_v55, %v426_v54  ;;  %v454_v55 = vld [vmem:[#allocation5 + $0x328] sm:$0xff] }
 0x5e3   :  { %477 = vmatpush.msrb.mxu2 %v454_v55 }
 0x5e4   :  { %v428_v57 = vmul.f32 %v427_v56, %v427_v56 }
 0x5e5   :  { %478 = vmatpush.msrb.mxu2 %v453_v2 }
 0x5e6   :  { %v429_v58 = vsel %vm184_vm0, %v428_v57, 0.0 }
 0x5e7   :  { %430 = vadd.xlane.f32.xlu2 %v429_v58  ;;  %479 = vmatpush.msrb.mxu2 %v452_v3 }
 0x5e9   :  { %480 = vmatpush.msrb.mxu2 %v451_v4 }
 0x5eb   :  { %481 = vmatpush.msrb.mxu2 %v450_v5 }
 0x5ed   :  { %482 = vmatpush.msrb.mxu2 %v449_v6 }
 0x65a   :  { %v431_v7 = vpop.xlane.xlu2 %430 }
 0x65b   :  { %v432_v8 = vmul.f32 0.03125, %v431_v7 }
 0x65d   :  { %v433_v9 = vadd.f32 1e-05, %v432_v8 }
 0x65f   :  { %567 = vrsqrt.f32 %v433_v9  ;;  %vm440_vm12 = vweird.f32 %v433_v9 }
 0x665   :  { %v568_v10 = vpop.eup %567 }
 0x666   :  { %v435_v11 = vmul.f32 %v568_v10, %v433_v9  ;;  %vm441_vm11 = vweird.f32 %v568_v10 }
 0x667   :  { %vm442_vm13 = vmor %vm440_vm12, %vm441_vm11 }
 0x668   :  { %v436_v12 = vmul.f32 %v568_v10, %v435_v11 }
 0x66a   :  { %v437_v13 = vmul.f32 0.5, %v436_v12 }
 0x66c   :  { %v438_v14 = vsub.f32 1.5, %v437_v13 }
 0x66e   :  { %v439_v15 = vmul.f32 %v568_v10, %v438_v14 }
 0x670   :  { %v443_v17 = vsel %vm442_vm13, %v568_v10, %v439_v15 }
 0x671   :  { %v444_v18 = vmul.f32 %v443_v17, %v427_v56 }
 0x673   :  { %v446_v20 = vmul.f32 %v557_v16, %v444_v18 }
 0x675   :  { %v448_v21 = vadd.f32 %v558_v19, %v446_v20 }
 0x677   :  { %483 = vmatmul.f32.vlgmr.msrb.gmra.mxu2 %v448_v21 }
 0x6fa   :  { %v484_v25 = vpop.f32.mrf.mxu2 }
 0x6fb   :  { %v485_v26 = vadd.f32 %v559_v24, %v484_v25 }
 0x6fd   :  { %v487_v28 = vmax.f32 %v485_v26, 0.0 }
 0x6ff   :  { %v495_v29 = vmul.f32 %v560_v27, %v487_v28 }
 0x701   :  { %v496_v30 = vsel %vm184_vm0, %v495_v29, 0.0 }
 0x702   :  { %497 = vadd.xlane.f32.xlu1 %v496_v30 }
 0x775   :  { %v498_v34 = vpop.xlane.xlu1 %497 }
 0x776   :  { %v500_v35 = vadd.f32 %v499_v33, %v498_v34 }
 0x778   :  { %v541_v36 = vmul.f32 -1.442695, %v500_v35 }
 0x77a   :  { %569 = vpow2.f32 %v541_v36 }
 0x780   :  { %v570_v37 = vpop.eup %569 }
 0x781   :  { %v504_v38 = vadd.f32 1.0, %v570_v37 }
 0x783   :  { %571 = vrcp.f32 %v504_v38  ;;  %v516_v43 = vand.u32 2147483648, %v504_v38  ;;  %v514_v45 = vand.u32 2147483647, %v504_v38  ;;  %vm510_vm0 = vweird.f32 %v504_v38 }
 0x785   :  { %v517_v47 = vor.u32 1.1754944e-38, %v516_v43  ;;  %vm515_vm2 = vcmp.eq.f32.partialorder %v514_v45, 8.507059e+37 }
 0x789   :  { %v572_v39 = vpop.eup %571 }
 0x78a   :  { %v506_v40 = vmul.f32 %v572_v39, %v504_v38  ;;  %vm511_vm15 = vweird.f32 %v572_v39 }
 0x78b   :  { %vm512_vm1 = vmor %vm510_vm0, %vm511_vm15 }
 0x78c   :  { %v507_v42 = vsub.f32 1.0, %v506_v40 }
 0x78e   :  { %v508_v44 = vmul.f32 %v572_v39, %v507_v42 }
 0x790   :  { %v509_v46 = vadd.f32 %v572_v39, %v508_v44 }
 0x792   :  { %v513_v48 = vsel %vm512_vm1, %v572_v39, %v509_v46 }
 0x793   :  { %v518_v49 = vsel %vm515_vm2, %v517_v47, %v513_v48 }
 0x794   :  { %520 = vst [vmem:[#allocation8] sm:$0x3] %v518_v49 }
 0x795   :  { %531 = dma.vmem_to_hbm [thread:$0]  %s527_s2, 32, %s529_s30, [#allocation4]  }
 0x796   :  { %673 = dma.done.wait [#allocation4], 32  }
 0x797   :  { %674 = vsyncadd [#allocation4], 4294967264 }
 0x798   :  { %536 = vsyncpa [#allocation3], 1 }
 0x799   :  { %537 = vsyncpa [#allocation6], 1 }
 0x79a   :  { %538 = vsyncpa [#allocation4], 1 }

</bundles_post_ra>
